<compile_context>
chip_gen: v6e
topology: v6e:2x2x1
jax: 0.10.0
libtpu: 0.0.40
codegen_flags: <defaults>
</compile_context>

<pallas_src>
import math

import jax
import jax.numpy as jnp
from jax import lax
from jax.experimental import pallas as pl
from jax.experimental.pallas import tpu as pltpu


def _round_up(x: int, m: int) -> int:
    return (x + m - 1) // m * m


def _make_flash_kernel(lk_valid: int, lk_padded: int, scale: float):
    """Builds the kernel body. Masks padded key positions iff lk_padded > lk_valid."""
    mask_needed = lk_padded != lk_valid

    def kernel(q_ref, k_ref, v_ref, o_ref, m_sc, l_sc, acc_sc):
        kv = pl.program_id(2)

        @pl.when(kv == 0)
        def _init():
            m_sc[...] = jnp.full_like(m_sc, -jnp.inf)
            l_sc[...] = jnp.zeros_like(l_sc)
            acc_sc[...] = jnp.zeros_like(acc_sc)

        # Native-dtype tiles (no f32 upcast of MXU operands).
        q = q_ref[...]                       # (Bt, tq, Dk)
        k = k_ref[...]                       # (Bt, tk, Dk)
        v = v_ref[...]                       # (Bt, tk, Dv_pad)

        # Fold 1/sqrt(Dk) into q (Lq*Dk mults instead of Lq*Lk).
        q = q * jnp.asarray(scale, dtype=q_ref.dtype)

        # scores: contract last dims of q and k -> no explicit transpose,
        # f32 accumulation on the MXU.
        s = jnp.einsum("bqd,bkd->bqk", q, k,
                       preferred_element_type=jnp.float32)   # (Bt, tq, tk) f32

        if mask_needed:
            tk = k.shape[1]
            col = kv * tk + lax.broadcasted_iota(jnp.int32, s.shape, 2)
            s = jnp.where(col < lk_valid, s, -jnp.inf)

        # Online (numerically stable) softmax statistics in f32.
        m_prev = m_sc[...]
        m_new = jnp.maximum(m_prev, jnp.max(s, axis=-1, keepdims=True))
        alpha = jnp.exp(m_prev - m_new)
        p = jnp.exp(s - m_new)               # unnormalized probabilities, f32

        l_sc[...] = alpha * l_sc[...] + jnp.sum(p, axis=-1, keepdims=True)
        acc_sc[...] = alpha * acc_sc[...] + jnp.einsum(
            "bqk,bkd->bqd", p.astype(v_ref.dtype), v,
            preferred_element_type=jnp.float32)
        m_sc[...] = m_new

        @pl.when(kv == pl.num_programs(2) - 1)
        def _finalize():
            # Deferred normalization: one EUP reciprocal + Lq*Dv multiplies.
            inv_l = pl.reciprocal(l_sc[...], approx=True)
            o_ref[...] = (acc_sc[...] * inv_l).astype(o_ref.dtype)

    return kernel


def scaled_dot_attention(query, key, value, *, tq_max=256, tk_max=512):
    """Pallas implementation of ScaledDotAttention.forward.

    query: [B, Lq, Dk]  key: [B, Lk, Dk]  value: [B, Lk, Dv] -> [B, Lq, Dv]
    """
    B, Lq, Dk = query.shape
    Bk, Lk, Dk2 = key.shape
    Bv, Lkv, Dv = value.shape
    assert B == Bk == Bv and Dk == Dk2 and Lk == Lkv

    out_dtype = query.dtype
    scale = 1.0 / math.sqrt(Dk)

    # ---- pad to TPU-friendly shapes ------------------------------------
    lq_pad = _round_up(Lq, 8)
    tq = min(lq_pad, tq_max)
    lq_pad = _round_up(lq_pad, tq)

    lk_pad = _round_up(Lk, 8)
    tk = min(lk_pad, tk_max)
    lk_pad = _round_up(lk_pad, tk)

    dv_pad = _round_up(Dv, 128)              # lane-dense output block

    q, k, v = query, key, value
    if lq_pad != Lq:
        q = jnp.pad(q, ((0, 0), (0, lq_pad - Lq), (0, 0)))
    if lk_pad != Lk:
        k = jnp.pad(k, ((0, 0), (0, lk_pad - Lk), (0, 0)))
        v = jnp.pad(v, ((0, 0), (0, lk_pad - Lk), (0, 0)))
    if dv_pad != Dv:
        v = jnp.pad(v, ((0, 0), (0, 0), (0, dv_pad - Dv)))

    nq = lq_pad // tq
    nk = lk_pad // tk

    # ---- fold small problems: several batch elements per grid step -----
    bt = 1
    if nq == 1 and nk == 1 and tq < 256:
        target = max(1, 256 // tq)
        for d in range(min(B, target), 0, -1):
            if B % d == 0:
                bt = d
                break

    grid = (B // bt, nq, nk)
    kernel = _make_flash_kernel(Lk, lk_pad, scale)

    itemsize = jnp.dtype(out_dtype).itemsize
    cost = pl.CostEstimate(
        flops=2 * B * Lq * Lk * (Dk + Dv),
        transcendentals=B * Lq * Lk,
        bytes_accessed=(q.size * q.dtype.itemsize
                        + k.size * k.dtype.itemsize
                        + v.size * v.dtype.itemsize
                        + B * lq_pad * dv_pad * itemsize),
    )

    out = pl.pallas_call(
        kernel,
        out_shape=jax.ShapeDtypeStruct((B, lq_pad, dv_pad), out_dtype),
        grid_spec=pltpu.PrefetchScalarGridSpec(
            num_scalar_prefetch=0,
            grid=grid,
            in_specs=[
                pl.BlockSpec((bt, tq, Dk), lambda b, qi, ki: (b, qi, 0)),
                pl.BlockSpec((bt, tk, Dk), lambda b, qi, ki: (b, ki, 0)),
                pl.BlockSpec((bt, tk, dv_pad), lambda b, qi, ki: (b, ki, 0)),
            ],
            out_specs=pl.BlockSpec((bt, tq, dv_pad),
                                   lambda b, qi, ki: (b, qi, 0)),
            scratch_shapes=[
                pltpu.VMEM((bt, tq, 1), jnp.float32),       # running max
                pltpu.VMEM((bt, tq, 1), jnp.float32),       # running denom
                pltpu.VMEM((bt, tq, dv_pad), jnp.float32),  # accumulator
            ],
        ),
        compiler_params=pltpu.CompilerParams(
            dimension_semantics=("parallel", "parallel", "arbitrary"),
            vmem_limit_bytes=32 * 1024 * 1024,
        ),
        cost_estimate=cost,
    )(q, k, v)

    if lq_pad != Lq or dv_pad != Dv:
        out = out[:, :Lq, :Dv]
    return out


def _reference(query, key, value):
    dim_k = key.shape[-1]
    scores = jnp.einsum("bqd,bkd->bqk", query, key) / math.sqrt(dim_k)
    weights = jax.nn.softmax(scores, axis=-1)
    return jnp.einsum("bqk,bkd->bqd", weights, value)


if __name__ == "__main__":
    key0 = jax.random.PRNGKey(0)
    kq, kk, kv_ = jax.random.split(key0, 3)

    # --- Test 1: small shapes consistent with the module (seq=8, hidden=32),
    #     exercising the batch-folded single-tile path.
    B, Lq, Lk, Dk, Dv = 2, 8, 8, 32, 32
    q = jax.random.normal(kq, (B, Lq, Dk), dtype=jnp.float32)
    k = jax.random.normal(kk, (B, Lk, Dk), dtype=jnp.float32)
    v = jax.random.normal(kv_, (B, Lk, Dv), dtype=jnp.float32)

    out = jax.block_until_ready(scaled_dot_attention(q, k, v))
    ref = jax.block_until_ready(_reference(q, k, v))
    assert out.shape == ref.shape
    # Tolerance relaxed slightly vs pure-f32: final normalization uses the
    # approximate EUP reciprocal.
    assert jnp.allclose(out, ref, atol=1e-2, rtol=1e-2), \
        float(jnp.max(jnp.abs(out - ref)))

    # --- Test 2: ragged shapes with tiny forced tiles — exercises padding,
    #     key masking and multi-tile online softmax accumulation.
    B2, Lq2, Lk2, Dk2, Dv2 = 3, 20, 37, 32, 48
    q2 = jax.random.normal(kq, (B2, Lq2, Dk2), dtype=jnp.float32)
    k2 = jax.random.normal(kk, (B2, Lk2, Dk2), dtype=jnp.float32)
    v2 = jax.random.normal(kv_, (B2, Lk2, Dv2), dtype=jnp.float32)
    out2 = jax.block_until_ready(
        scaled_dot_attention(q2, k2, v2, tq_max=8, tk_max=16))
    ref2 = jax.block_until_ready(_reference(q2, k2, v2))
    assert jnp.allclose(out2, ref2, atol=1e-2, rtol=1e-2), \
        float(jnp.max(jnp.abs(out2 - ref2)))

    print("KERNEL_OK")
</pallas_src>

<mosaic_0001>
module attributes {stable_mosaic.version = 11 : i64} {
  func.func @kernel(%arg0: i32, %arg1: i32, %arg2: i32, %arg3: memref<2x8x32xf32, #tpu.memory_space<vmem>>, %arg4: memref<2x8x32xf32, #tpu.memory_space<vmem>>, %arg5: memref<2x8x128xf32, #tpu.memory_space<vmem>>, %arg6: memref<2x8x128xf32, #tpu.memory_space<vmem>>, %arg7: memref<2x8x1xf32, #tpu.memory_space<vmem>>, %arg8: memref<2x8x1xf32, #tpu.memory_space<vmem>>, %arg9: memref<2x8x128xf32, #tpu.memory_space<vmem>>) attributes {dimension_semantics = [#tpu.dimension_semantics<parallel>, #tpu.dimension_semantics<parallel>, #tpu.dimension_semantics<arbitrary>], iteration_bounds = array<i64: 1, 1, 1>, scalar_prefetch = 0 : i64, scratch_operands = 3 : i64, tpu.core_type = #tpu.core_type<tc>, window_params = [{transform_indices = @transform_0, window_bounds = array<i64: 2, 8, 32>}, {transform_indices = @transform_1, window_bounds = array<i64: 2, 8, 32>}, {transform_indices = @transform_2, window_bounds = array<i64: 2, 8, 128>}, {transform_indices = @transform_3, window_bounds = array<i64: 2, 8, 128>}]} {
    %c0_i32 = arith.constant 0 : i32
    %0 = arith.cmpi eq, %arg2, %c0_i32 : i32
    %1 = arith.extui %0 : i1 to i32
    %c0_i32_0 = arith.constant 0 : i32
    %2 = arith.cmpi ne, %1, %c0_i32_0 : i32
    scf.if %2 {
      %cst_33 = arith.constant 0xFF800000 : f32
      %34 = vector.broadcast %cst_33 : f32 to vector<2x8x1xf32>
      %c0_34 = arith.constant 0 : index
      %c0_35 = arith.constant 0 : index
      %c0_36 = arith.constant 0 : index
      %35 = vector.load %arg7[%c0_34, %c0_35, %c0_36] : memref<2x8x1xf32, #tpu.memory_space<vmem>>, vector<2x8x1xf32>
      tpu.vector_store %arg7[%c0_34, %c0_35, %c0_36], %34 {strides = array<i32>} : memref<2x8x1xf32, #tpu.memory_space<vmem>>, vector<2x8x1xf32>,
      %cst_37 = arith.constant 0.000000e+00 : f32
      %36 = vector.broadcast %cst_37 : f32 to vector<2x8x1xf32>
      %c0_38 = arith.constant 0 : index
      %c0_39 = arith.constant 0 : index
      %c0_40 = arith.constant 0 : index
      %37 = vector.load %arg8[%c0_38, %c0_39, %c0_40] : memref<2x8x1xf32, #tpu.memory_space<vmem>>, vector<2x8x1xf32>
      tpu.vector_store %arg8[%c0_38, %c0_39, %c0_40], %36 {strides = array<i32>} : memref<2x8x1xf32, #tpu.memory_space<vmem>>, vector<2x8x1xf32>,
      %cst_41 = arith.constant 0.000000e+00 : f32
      %38 = vector.broadcast %cst_41 : f32 to vector<2x8x128xf32>
      %c0_42 = arith.constant 0 : index
      %c0_43 = arith.constant 0 : index
      %c0_44 = arith.constant 0 : index
      %39 = vector.load %arg9[%c0_42, %c0_43, %c0_44] : memref<2x8x128xf32, #tpu.memory_space<vmem>>, vector<2x8x128xf32>
      tpu.vector_store %arg9[%c0_42, %c0_43, %c0_44], %38 {strides = array<i32>} : memref<2x8x128xf32, #tpu.memory_space<vmem>>, vector<2x8x128xf32>,
    } else {
    }
    %c0 = arith.constant 0 : index
    %c0_1 = arith.constant 0 : index
    %c0_2 = arith.constant 0 : index
    %3 = vector.load %arg3[%c0, %c0_1, %c0_2] : memref<2x8x32xf32, #tpu.memory_space<vmem>>, vector<2x8x32xf32>
    %c0_3 = arith.constant 0 : index
    %c0_4 = arith.constant 0 : index
    %c0_5 = arith.constant 0 : index
    %4 = vector.load %arg4[%c0_3, %c0_4, %c0_5] : memref<2x8x32xf32, #tpu.memory_space<vmem>>, vector<2x8x32xf32>
    %c0_6 = arith.constant 0 : index
    %c0_7 = arith.constant 0 : index
    %c0_8 = arith.constant 0 : index
    %5 = vector.load %arg5[%c0_6, %c0_7, %c0_8] : memref<2x8x128xf32, #tpu.memory_space<vmem>>, vector<2x8x128xf32>
    %cst = arith.constant 0.176776692 : f32
    %6 = vector.broadcast %cst : f32 to vector<2x8x32xf32>
    %7 = arith.mulf %3, %6 : vector<2x8x32xf32>
    "tpu.trace_start"() <{level = 10 : i32, message = "bqd,bkd->bqk"}> : () -> ()
    %cst_9 = arith.constant dense<0.000000e+00> : vector<2x8x8xf32>
    %8 = tpu.matmul %7, %4, %cst_9 {dimension_numbers = #tpu.dot_dimension_numbers<[2], [2], [1], [1], [0, 0, 0, 1, 1, 1], [0], [0]>} : vector<2x8x32xf32>, vector<2x8x32xf32>, vector<2x8x8xf32> -> vector<2x8x8xf32>
    "tpu.trace_stop"() : () -> ()
    %c0_10 = arith.constant 0 : index
    %c0_11 = arith.constant 0 : index
    %c0_12 = arith.constant 0 : index
    %9 = vector.load %arg7[%c0_10, %c0_11, %c0_12] : memref<2x8x1xf32, #tpu.memory_space<vmem>>, vector<2x8x1xf32>
    %cst_13 = arith.constant dense<0xFF800000> : vector<2x8xf32>
    %10 = vector.multi_reduction <maximumf>, %8, %cst_13 [2] : vector<2x8x8xf32> to vector<2x8xf32>
    %11 = vector.shape_cast %10 : vector<2x8xf32> to vector<2x8x1xf32>
    %12 = arith.maximumf %9, %11 : vector<2x8x1xf32>
    %13 = arith.subf %9, %12 : vector<2x8x1xf32>
    %14 = math.exp %13 : vector<2x8x1xf32>
    %15 = vector.broadcast %12 : vector<2x8x1xf32> to vector<2x8x8xf32>
    %16 = arith.subf %8, %15 : vector<2x8x8xf32>
    %17 = math.exp %16 : vector<2x8x8xf32>
    %c0_14 = arith.constant 0 : index
    %c0_15 = arith.constant 0 : index
    %c0_16 = arith.constant 0 : index
    %18 = vector.load %arg8[%c0_14, %c0_15, %c0_16] : memref<2x8x1xf32, #tpu.memory_space<vmem>>, vector<2x8x1xf32>
    %19 = arith.mulf %14, %18 : vector<2x8x1xf32>
    %cst_17 = arith.constant dense<0.000000e+00> : vector<2x8xf32>
    %20 = vector.multi_reduction <add>, %17, %cst_17 [2] : vector<2x8x8xf32> to vector<2x8xf32>
    %21 = vector.shape_cast %20 : vector<2x8xf32> to vector<2x8x1xf32>
    %22 = arith.addf %19, %21 : vector<2x8x1xf32>
    %c0_18 = arith.constant 0 : index
    %c0_19 = arith.constant 0 : index
    %c0_20 = arith.constant 0 : index
    %23 = vector.load %arg8[%c0_18, %c0_19, %c0_20] : memref<2x8x1xf32, #tpu.memory_space<vmem>>, vector<2x8x1xf32>
    tpu.vector_store %arg8[%c0_18, %c0_19, %c0_20], %22 {strides = array<i32>} : memref<2x8x1xf32, #tpu.memory_space<vmem>>, vector<2x8x1xf32>,
    %c0_21 = arith.constant 0 : index
    %c0_22 = arith.constant 0 : index
    %c0_23 = arith.constant 0 : index
    %24 = vector.load %arg9[%c0_21, %c0_22, %c0_23] : memref<2x8x128xf32, #tpu.memory_space<vmem>>, vector<2x8x128xf32>
    %25 = vector.broadcast %14 : vector<2x8x1xf32> to vector<2x8x128xf32>
    %26 = arith.mulf %25, %24 : vector<2x8x128xf32>
    "tpu.trace_start"() <{level = 10 : i32, message = "bqk,bkd->bqd"}> : () -> ()
    %cst_24 = arith.constant dense<0.000000e+00> : vector<2x8x128xf32>
    %27 = tpu.matmul %17, %5, %cst_24 {dimension_numbers = #tpu.dot_dimension_numbers<[2], [1], [1], [2], [0, 0, 0, 1, 1, 2], [0], [0]>} : vector<2x8x8xf32>, vector<2x8x128xf32>, vector<2x8x128xf32> -> vector<2x8x128xf32>
    "tpu.trace_stop"() : () -> ()
    %28 = arith.addf %26, %27 : vector<2x8x128xf32>
    %c0_25 = arith.constant 0 : index
    %c0_26 = arith.constant 0 : index
    %c0_27 = arith.constant 0 : index
    %29 = vector.load %arg9[%c0_25, %c0_26, %c0_27] : memref<2x8x128xf32, #tpu.memory_space<vmem>>, vector<2x8x128xf32>
    tpu.vector_store %arg9[%c0_25, %c0_26, %c0_27], %28 {strides = array<i32>} : memref<2x8x128xf32, #tpu.memory_space<vmem>>, vector<2x8x128xf32>,
    %c0_28 = arith.constant 0 : index
    %c0_29 = arith.constant 0 : index
    %c0_30 = arith.constant 0 : index
    %30 = vector.load %arg7[%c0_28, %c0_29, %c0_30] : memref<2x8x1xf32, #tpu.memory_space<vmem>>, vector<2x8x1xf32>
    tpu.vector_store %arg7[%c0_28, %c0_29, %c0_30], %12 {strides = array<i32>} : memref<2x8x1xf32, #tpu.memory_space<vmem>>, vector<2x8x1xf32>,
    %c0_i32_31 = arith.constant 0 : i32
    %31 = arith.cmpi eq, %arg2, %c0_i32_31 : i32
    %32 = arith.extui %31 : i1 to i32
    %c0_i32_32 = arith.constant 0 : i32
    %33 = arith.cmpi ne, %32, %c0_i32_32 : i32
    scf.if %33 {
      %c0_33 = arith.constant 0 : index
      %c0_34 = arith.constant 0 : index
      %c0_35 = arith.constant 0 : index
      %34 = vector.load %arg8[%c0_33, %c0_34, %c0_35] : memref<2x8x1xf32, #tpu.memory_space<vmem>>, vector<2x8x1xf32>
      %35 = tpu.reciprocal %34 {approx = true} : vector<2x8x1xf32> -> vector<2x8x1xf32>
      %c0_36 = arith.constant 0 : index
      %c0_37 = arith.constant 0 : index
      %c0_38 = arith.constant 0 : index
      %36 = vector.load %arg9[%c0_36, %c0_37, %c0_38] : memref<2x8x128xf32, #tpu.memory_space<vmem>>, vector<2x8x128xf32>
      %37 = vector.broadcast %35 : vector<2x8x1xf32> to vector<2x8x128xf32>
      %38 = arith.mulf %36, %37 : vector<2x8x128xf32>
      %c0_39 = arith.constant 0 : index
      %c0_40 = arith.constant 0 : index
      %c0_41 = arith.constant 0 : index
      %39 = vector.load %arg6[%c0_39, %c0_40, %c0_41] : memref<2x8x128xf32, #tpu.memory_space<vmem>>, vector<2x8x128xf32>
      tpu.vector_store %arg6[%c0_39, %c0_40, %c0_41], %38 {strides = array<i32>} : memref<2x8x128xf32, #tpu.memory_space<vmem>>, vector<2x8x128xf32>,
    } else {
    }
    return
  }
  func.func @transform_0(%arg0: i32, %arg1: i32, %arg2: i32) -> (i32, i32, i32) {
    %c0_i32 = arith.constant 0 : i32
    %c0_i32_0 = arith.constant 0 : i32
    return %arg0, %arg1, %c0_i32 : i32, i32, i32
  }
  func.func @transform_1(%arg0: i32, %arg1: i32, %arg2: i32) -> (i32, i32, i32) {
    %c0_i32 = arith.constant 0 : i32
    %c0_i32_0 = arith.constant 0 : i32
    return %arg0, %arg2, %c0_i32 : i32, i32, i32
  }
  func.func @transform_2(%arg0: i32, %arg1: i32, %arg2: i32) -> (i32, i32, i32) {
    %c0_i32 = arith.constant 0 : i32
    %c0_i32_0 = arith.constant 0 : i32
    return %arg0, %arg2, %c0_i32 : i32, i32, i32
  }
  func.func @transform_3(%arg0: i32, %arg1: i32, %arg2: i32) -> (i32, i32, i32) {
    %c0_i32 = arith.constant 0 : i32
    %c0_i32_0 = arith.constant 0 : i32
    return %arg0, %arg1, %c0_i32 : i32, i32, i32
  }
}

</mosaic_0001>

<bundles_post_ra>
// kernel: tpu_custom_call.1
= control target key start
LH: loop header
LB: loop body
LE: loop exit
PB: predicated region body
PF: predicated region fallthrough
CT: control target
= control target key end

     0   :  { %8 = vsyncpa [#allocation6], 0  ;;  %s699_s0 = inlined_call_operand.hbm [shape: f32[2,8,32], index: 0, kind: input, shape index: {}]   ;;  %s700_s1 = inlined_call_operand.hbm [shape: f32[2,8,32], index: 1, kind: input, shape index: {}]   ;;  %s701_s2 = inlined_call_operand.hbm [shape: f32[2,8,128], index: 2, kind: input, shape index: {}]   ;;  %s702_s3 = inlined_call_operand.hbm [shape: f32[2,8,128], index: 3, kind: output, shape index: {}]  }
   0x1   :  { %9 = vsyncpa [#allocation9], 0 }
   0x2   :  { %10 = vsyncpa [#allocation7], 0  ;;  %s627_s12 = smov [#allocation8]   ;;  %s628_s14 = smov [#allocation5]  }
   0x3   :  { %s28_s13 = sshll.u32 %s627_s12, 4  ;;  %s16_s15 = sshll.u32 %s628_s14, 4  ;;  %s29_s13 = int_to_ptr.vmem [resolvable:$true] %s28_s13  ;;  %s17_s15 = int_to_ptr.vmem [resolvable:$true] %s16_s15 }
   0x4   :  { %s549_s16 = scalar_lea.vmem %s29_s13, 256  ;;  %p554_p1 = scmp.lt.s32.totalorder %s29_s13, %s29_s13 }
   0x5   :  { %p550_p0 = scmp.ne.s32.totalorder %s29_s13, %s549_s16  ;;  %p555_p2 = scmp.lt.s32.totalorder %s549_s16, %s549_s16 }
   0x7   :  { %p556_p3 = por %p555_p2, %p554_p1 }
   0x9   :  { %p557_p4 = pnand %p556_p3, %p550_p0 }
   0xb   :  { %560 = shalt.err (!%p557_p4)
}
   0xc   :  { %s629_s17 = smov 128   ;;  %s630_s18 = smov 8  }
   0xd   :  { %34 = dma.hbm_to_vmem [thread:$0]  %s700_s1, 256, %s29_s13, [#allocation9], %s629_s17, %s629_s17, %s630_s18  }
   0xe   :  { %s569_s21 = scalar_lea.vmem %s17_s15, 256  ;;  %p574_p6 = scmp.lt.s32.totalorder %s17_s15, %s17_s15 }
   0xf   :  { %p570_p5 = scmp.ne.s32.totalorder %s17_s15, %s569_s21  ;;  %p575_p7 = scmp.lt.s32.totalorder %s569_s21, %s569_s21 }
  0x11   :  { %p576_p8 = por %p575_p7, %p574_p6 }
  0x13   :  { %p577_p9 = pnand %p576_p8, %p570_p5 }
  0x15   :  { %580 = shalt.err (!%p577_p9)
}
  0x16   :  { %22 = dma.hbm_to_vmem [thread:$0]  %s699_s0, 256, %s17_s15, [#allocation6], %s629_s17, %s629_s17, %s630_s18  }
  0x17   :  { %s631_s24 = smov [#allocation10]  }
  0x18   :  { %s40_s25 = sshll.u32 %s631_s24, 4  ;;  %s41_s25 = int_to_ptr.vmem [resolvable:$true] %s40_s25 }
  0x19   :  { %s589_s26 = scalar_lea.vmem %s41_s25, 256  ;;  %p594_p11 = scmp.lt.s32.totalorder %s41_s25, %s41_s25 }
  0x1a   :  { %p590_p10 = scmp.ne.s32.totalorder %s41_s25, %s589_s26  ;;  %p595_p12 = scmp.lt.s32.totalorder %s589_s26, %s589_s26 }
  0x1c   :  { %p596_p13 = por %p595_p12, %p594_p11 }
  0x1e   :  { %p597_p0 = pnand %p596_p13, %p590_p10 }
  0x20   :  { %600 = shalt.err (!%p597_p0)
}
  0x21   :  { %46 = dma.hbm_to_vmem [thread:$0]  %s701_s2, 256, %s41_s25, [#allocation9], %s629_s17, %s629_s17, %s630_s18  }
  0x22   :  { %621 = dma.done.wait [#allocation6], 256  }
  0x23   :  { %622 = vsyncadd [#allocation6], 4294967040 }
  0x24   :  { %623 = dma.done.wait [#allocation9], 512  }
  0x25   :  { %624 = vsyncadd [#allocation9], 4294966784  ;;  %v632_v0 = vmov 0.0   ;;  %vm633_vm0 = vmmov 0   ;;  %vm75_vm1 = vcmask 261120   ;;  %v69_v1 = vld [vmem:[#allocation8] sm:$0xff] }
  0x26   :  { %497 = vmatprep.subr.mxu0 %v632_v0  ;;  %502 = vmatprep.subr.mxu1 %v632_v0  ;;  %v70_v2 = vld [vmem:[#allocation8 + $0x8] sm:$0xff]  ;;  %v67_v3 = vld [vmem:[#allocation5] sm:$0xff]  ;;  %v68_v5 = vld [vmem:[#allocation5 + $0x8] sm:$0xff]  ;;  %vm60_vm2 = vcmask 7168   ;;  %v634_v7 = vmov -inf   ;;  %vm230_vm3 = vcmask 64512  }
  0x27   :  { %499 = vmatprep.mubr.msk.f32.mxu0 %vm633_vm0, %v632_v0  ;;  %504 = vmatprep.mubr.msk.f32.mxu1 %vm633_vm0, %v632_v0  ;;  %v73_v4 = vmul.f32 0.17677669, %v67_v3  ;;  %v74_v6 = vmul.f32 0.17677669, %v68_v5  ;;  %61 = vst.msk [vmem:[#allocation2] sm:$0xff] %vm60_vm2, %v634_v7  ;;  %62 = vst.msk [vmem:[#allocation2 + $0x8] sm:$0xff] %vm60_vm2, %v634_v7 }
  0x28   :  { %498 = vmatpush3.xpose.msk.msra.mxu0 %vm75_vm1, %v69_v1  ;;  %503 = vmatpush3.xpose.msk.msra.mxu1 %vm75_vm1, %v70_v2  ;;  %63 = vst.msk [vmem:[#allocation3] sm:$0xff] %vm60_vm2, %v632_v0  ;;  %64 = vst.msk [vmem:[#allocation3 + $0x8] sm:$0xff] %vm60_vm2, %v632_v0  ;;  %v635_v14 = vmov 0   ;;  %v71_v23 = vld [vmem:[#allocation10] sm:$0xff]  ;;  %v72_v24 = vld [vmem:[#allocation10 + $0x8] sm:$0xff]  ;;  %s636_s0 = smov [#allocation11]  }
  0x29   :  { %507 = vmatprep.subr.mxu0 %v632_v0  ;;  %512 = vmatprep.subr.mxu1 %v632_v0  ;;  %s470_s2 = sshll.u32 %s636_s0, 4  ;;  %s471_s2 = int_to_ptr.vmem [resolvable:$true] %s470_s2 }
  0x2a   :  { %527 = vset.pattern.permute.xlu1 %v635_v14  ;;  %528 = vset.pattern.permute.xlu0 %v635_v14  ;;  %s601_s28 = scalar_lea.vmem %s471_s2, 256  ;;  %p606_p2 = scmp.lt.s32.totalorder %s471_s2, %s471_s2 }
  0x2b   :  { %500 = vmatmul.mubr.msk.f32.vlgmr.msra.gmra.mxu0 %vm75_vm1, %v73_v4  ;;  %505 = vmatmul.mubr.msk.f32.vlgmr.msra.gmra.mxu1 %vm75_vm1, %v74_v6  ;;  %p602_p1 = scmp.ne.s32.totalorder %s471_s2, %s601_s28  ;;  %p607_p3 = scmp.lt.s32.totalorder %s601_s28, %s601_s28 }
  0x2c   :  { %509 = vmatprep.mubr.msk.f32.mxu0 %vm633_vm0, %v632_v0  ;;  %514 = vmatprep.mubr.msk.f32.mxu1 %vm633_vm0, %v632_v0 }
  0x2d   :  { %508 = vmatpush3.msra.mxu0 %v71_v23  ;;  %513 = vmatpush3.msra.mxu1 %v72_v24  ;;  %p608_p4 = por %p607_p3, %p606_p2 }
  0x2e   :  { %v228_v15 = vld [vmem:[#allocation2] sm:$0xff]  ;;  %v229_v18 = vld [vmem:[#allocation2 + $0x8] sm:$0xff] }
  0x2f   :  { %v261_v39 = vld [vmem:[#allocation3] sm:$0xff]  ;;  %v262_v42 = vld [vmem:[#allocation3 + $0x8] sm:$0xff]  ;;  %p609_p5 = pnand %p608_p4, %p602_p1 }
  0xeb   :  { %v148_v8 = vpop.f32.mrf.mxu0  ;;  %v224_v9 = vpop.f32.mrf.mxu1 }
  0xec   :  { %v231_v10 = vsel %vm230_vm3, %v148_v8, -inf  ;;  %v234_v13 = vsel %vm230_vm3, %v224_v9, -inf }
  0xed   :  { %232 = vmax.xlane.f32.xlu0 %v231_v10  ;;  %v501_v11 = vpop.f32.mrf.mxu0  ;;  %v506_v12 = vpop.f32.mrf.mxu1 }
  0xf1   :  { %235 = vmax.xlane.f32.xlu0 %v234_v13 }
 0x176   :  { %v233_v16 = vpop.xlane.xlu0 %232 }
 0x177   :  { %v237_v17 = vmax.f32 %v228_v15, %v233_v16 }
 0x179   :  { %v239_v19 = vsub.f32 %v228_v15, %v237_v17  ;;  %440 = vst.msk [vmem:[#allocation2] sm:$0xff] %vm60_vm2, %v237_v17  ;;  %247 = vperm.xlu1 %527, %v237_v17  }
 0x17a   :  { %v236_v20 = vpop.xlane.xlu0 %235 }
 0x17b   :  { %v238_v21 = vmax.f32 %v229_v18, %v236_v20  ;;  %v241_v36 = vmul.f32 1.442695, %v239_v19 }
 0x17d   :  { %v240_v22 = vsub.f32 %v229_v18, %v238_v21  ;;  %441 = vst.msk [vmem:[#allocation2 + $0x8] sm:$0xff] %vm60_vm2, %v238_v21  ;;  %252 = vperm.xlu1 %527, %v238_v21  }
 0x17f   :  { %v243_v34 = vmul.f32 1.442695, %v240_v22 }
 0x1f4   :  { %v248_v25 = vpop.permute.xlu1 %247 }
 0x1f5   :  { %v255_v26 = vsub.f32 %v148_v8, %v248_v25 }
 0x1f7   :  { %v257_v27 = vmul.f32 1.442695, %v255_v26 }
 0x1f8   :  { %v253_v28 = vpop.permute.xlu1 %252 }
 0x1f9   :  { %529 = vpow2.f32 %v257_v27  ;;  %v256_v29 = vsub.f32 %v224_v9, %v253_v28 }
 0x1fb   :  { %v259_v30 = vmul.f32 1.442695, %v256_v29 }
 0x1fd   :  { %531 = vpow2.f32 %v259_v30 }
 0x1fe   :  { %533 = vpow2.f32 %v243_v34 }
 0x1ff   :  { %535 = vpow2.f32 %v241_v36 }
 0x206   :  { %v530_v31 = vpop.eup %529 }
 0x207   :  { %510 = vmatmul.mubr.msk.f32.vlgmr.msra.gmra.mxu0 %vm230_vm3, %v530_v31  ;;  %v265_v32 = vsel %vm230_vm3, %v530_v31, 0.0 }
 0x208   :  { %266 = vadd.xlane.f32.xlu0 %v265_v32 }
 0x20a   :  { %v532_v33 = vpop.eup %531 }
 0x20b   :  { %515 = vmatmul.mubr.msk.f32.vlgmr.msra.gmra.mxu1 %vm230_vm3, %v532_v33  ;;  %v268_v35 = vsel %vm230_vm3, %v532_v33, 0.0  ;;  %v534_v37 = vpop.eup %533 }
 0x20c   :  { %269 = vadd.xlane.f32.xlu1 %v268_v35  ;;  %v536_v38 = vpop.eup %535  ;;  %v264_v44 = vmul.f32 %v534_v37, %v262_v42 }
 0x20d   :  { %v263_v40 = vmul.f32 %v536_v38, %v261_v39 }
 0x21d   :  { %285 = vperm.xlu1 %527, %v534_v37  }
 0x21e   :  { %280 = vperm.xlu0 %528, %v536_v38  }
 0x291   :  { %v267_v41 = vpop.xlane.xlu0 %266 }
 0x292   :  { %v271_v43 = vadd.f32 %v267_v41, %v263_v40 }
 0x294   :  { %274 = vst.msk [vmem:[#allocation3] sm:$0xff] %vm60_vm2, %v271_v43 }
 0x295   :  { %v270_v45 = vpop.xlane.xlu1 %269 }
 0x296   :  { %v272_v46 = vadd.f32 %v270_v45, %v264_v44 }
 0x298   :  { %275 = vst.msk [vmem:[#allocation3 + $0x8] sm:$0xff] %vm60_vm2, %v272_v46 }
 0x299   :  { %v281_v55 = vpop.permute.xlu0 %280  ;;  %v286_v57 = vpop.permute.xlu1 %285 }
 0x29a   :  { %v288_v56 = vmul.f32 0.0, %v281_v55  ;;  %v289_v60 = vmul.f32 0.0, %v286_v57 }
 0x29b   :  { %v445_v47 = vld [vmem:[#allocation3] sm:$0xff] }
 0x29c   :  { %537 = vrcp.f32 %v445_v47 }
 0x29f   :  { %v446_v48 = vld [vmem:[#allocation3 + $0x8] sm:$0xff] }
 0x2a0   :  { %539 = vrcp.f32 %v446_v48 }
 0x2a9   :  { %v538_v49 = vpop.eup %537 }
 0x2aa   :  { %453 = vperm.xlu0 %528, %v538_v49  }
 0x2ad   :  { %v540_v50 = vpop.eup %539 }
 0x2ae   :  { %458 = vperm.xlu0 %528, %v540_v50  }
 0x2c7   :  { %v359_v51 = vpop.f32.mrf.mxu0 }
 0x2c8   :  { %v436_v58 = vadd.f32 %v359_v51, %v288_v56 }
 0x2c9   :  { %v511_v52 = vpop.f32.mrf.mxu0 }
 0x2cb   :  { %v432_v53 = vpop.f32.mrf.mxu1 }
 0x2cc   :  { %v437_v62 = vadd.f32 %v432_v53, %v289_v60 }
 0x2cd   :  { %v516_v54 = vpop.f32.mrf.mxu1 }
 0x325   :  { %v454_v59 = vpop.permute.xlu0 %453 }
 0x326   :  { %v461_v61 = vmul.f32 %v454_v59, %v436_v58 }
 0x328   :  { %463 = vst [vmem:[#allocation11] sm:$0xff] %v461_v61 }
 0x329   :  { %v459_v63 = vpop.permute.xlu0 %458 }
 0x32a   :  { %v462_v0 = vmul.f32 %v459_v63, %v437_v62 }
 0x32c   :  { %464 = vst [vmem:[#allocation11 + $0x8] sm:$0xff] %v462_v0 }
 0x32d   :  { %612 = shalt.err (!%p609_p5)
}
 0x32e   :  { %476 = dma.vmem_to_hbm [thread:$0]  %s471_s2, 256, %s702_s3, [#allocation7], %s629_s17, %s629_s17, %s630_s18  }
 0x32f   :  { %625 = dma.done.wait [#allocation7], 256  }
 0x330   :  { %626 = vsyncadd [#allocation7], 4294967040 }
 0x331   :  { %480 = vsyncpa [#allocation6], 1 }
 0x332   :  { %481 = vsyncpa [#allocation9], 1 }
 0x333   :  { %482 = vsyncpa [#allocation7], 1 }

</bundles_post_ra>
